<compile_context>
chip_gen: v7x
topology: tpu7x:2x2x1
jax: 0.10.0
libtpu: 0.0.40
codegen_flags: <defaults>
</compile_context>

<pallas_src>
import functools

import jax
import jax.numpy as jnp
from jax.experimental import pallas as pl
from jax.experimental.pallas import tpu as pltpu


def _contrastive_kernel(o1_ref, o2_ref, w_ref, loss_ref, *, margin, eps, inv_n):
    step = pl.program_id(0)

    @pl.when(step == 0)
    def _():
        loss_ref[...] = jnp.zeros_like(loss_ref)

    diff = (o1_ref[...].astype(jnp.float32)
            - o2_ref[...].astype(jnp.float32) + eps)
    sq = jnp.sum(diff * diff, axis=-1, keepdims=True)       # (tile_b, 1) == d^2
    dist = jnp.sqrt(sq)                                      # EUP
    hinge = jnp.maximum(margin - dist, 0.0)
    w0 = w_ref[:, 0:1]                                       # (1-label) * mask
    w1 = w_ref[:, 1:2]                                       # label * mask
    per_row = w0 * sq + w1 * (hinge * hinge)
    loss_ref[...] += jnp.sum(per_row)

    @pl.when(step == pl.num_programs(0) - 1)
    def _():
        loss_ref[...] = loss_ref[...] * inv_n


def contrastive_loss(output1, output2, label, *, margin=2.0, eps=1e-6,
                     tile_b=None):
    """output1, output2: (B, D); label: (B,) in {0,1}.  Returns scalar loss."""
    assert output1.ndim == 2 and output1.shape == output2.shape
    B, D = output1.shape
    f32 = jnp.float32
    label = jnp.asarray(label, f32).reshape(B)

    # Fold (1 - label) / label into per-row weights wrapper-side.
    w = jnp.stack([1.0 - label, label], axis=-1).astype(f32)      # (B, 2)

    itemsize = jnp.dtype(output1.dtype).itemsize
    if tile_b is None:
        # Mem-bound kernel: biggest batch tile with ~2 MiB per input tile
        # (2 inputs x 2 pipeline buffers -> ~8 MiB, safe under default VMEM).
        budget = 2 * 1024 * 1024
        tile_b = min(4096, max(8, budget // max(1, D * itemsize)))
    tile_b = max(8, (tile_b // 8) * 8)
    # Don't make the tile larger than the (sublane-rounded) batch.
    tile_b = min(tile_b, ((B + 7) // 8) * 8)

    Bp = ((B + tile_b - 1) // tile_b) * tile_b
    pad = Bp - B

    # Padded rows get zero weights -> contribute exactly nothing to the sum.
    o1 = jnp.pad(output1, ((0, pad), (0, 0)))
    o2 = jnp.pad(output2, ((0, pad), (0, 0)))
    w = jnp.pad(w, ((0, pad), (0, 0)))

    grid = (Bp // tile_b,)
    kernel = functools.partial(
        _contrastive_kernel,
        margin=float(margin), eps=float(eps), inv_n=1.0 / float(B))

    cost = pl.CostEstimate(
        flops=4 * Bp * D + 8 * Bp,
        transcendentals=Bp,                                  # one sqrt per row
        bytes_accessed=2 * Bp * D * itemsize + Bp * 2 * 4 + 4,
    )

    loss = pl.pallas_call(
        kernel,
        out_shape=jax.ShapeDtypeStruct((1, 1), f32),
        grid=grid,
        in_specs=[
            pl.BlockSpec((tile_b, D), lambda i: (i, 0)),     # output1 tile
            pl.BlockSpec((tile_b, D), lambda i: (i, 0)),     # output2 tile
            pl.BlockSpec((tile_b, 2), lambda i: (i, 0)),     # [(1-l)*m, l*m]
        ],
        out_specs=pl.BlockSpec((1, 1), lambda i: (0, 0)),    # resident scalar acc
        compiler_params=pltpu.CompilerParams(
            dimension_semantics=("arbitrary",)),             # reduction axis
        cost_estimate=cost,
    )(o1, o2, w)
    return loss[0, 0]


def reference_contrastive_loss(o1, o2, label, margin=2.0, eps=1e-6):
    d = jnp.sqrt(jnp.sum((o1 - o2 + eps) ** 2, axis=-1))
    return jnp.mean((1.0 - label) * d ** 2
                    + label * jnp.maximum(margin - d, 0.0) ** 2)


if __name__ == "__main__":
    key = jax.random.PRNGKey(0)
    k1, k2, k3 = jax.random.split(key, 3)

    # Small shapes: B=13 (exercises batch padding), D=128.
    B, D = 13, 128
    out1 = jax.random.normal(k1, (B, D), jnp.float32)
    out2 = jax.random.normal(k2, (B, D), jnp.float32)
    label = jax.random.bernoulli(k3, 0.5, (B,)).astype(jnp.float32)

    ref = reference_contrastive_loss(out1, out2, label, margin=2.0)

    # Small tile -> grid=(2,): exercises the cross-step resident accumulator.
    loss = contrastive_loss(out1, out2, label, margin=2.0, tile_b=8)
    loss = jax.block_until_ready(loss)
    assert loss.shape == ()
    assert jnp.allclose(loss, ref, atol=1e-5, rtol=1e-5), (loss, ref)

    # Default (auto) tile path.
    loss2 = contrastive_loss(out1, out2, label, margin=2.0)
    loss2 = jax.block_until_ready(loss2)
    assert jnp.allclose(loss2, ref, atol=1e-5, rtol=1e-5), (loss2, ref)

    print("KERNEL_OK")
</pallas_src>

<mosaic_0001>
module attributes {stable_mosaic.version = 11 : i64} {
  func.func @_contrastive_kernel(%arg0: i32, %arg1: memref<8x128xf32, #tpu.memory_space<vmem>>, %arg2: memref<8x128xf32, #tpu.memory_space<vmem>>, %arg3: memref<8x2xf32, #tpu.memory_space<vmem>>, %arg4: memref<1x1xf32, #tpu.memory_space<vmem>>) attributes {dimension_semantics = [#tpu.dimension_semantics<arbitrary>], iteration_bounds = array<i64: 2>, scalar_prefetch = 0 : i64, scratch_operands = 0 : i64, tpu.core_type = #tpu.core_type<tc>, window_params = [{transform_indices = @transform_0, window_bounds = array<i64: 8, 128>}, {transform_indices = @transform_1, window_bounds = array<i64: 8, 128>}, {transform_indices = @transform_2, window_bounds = array<i64: 8, 2>}, {pipeline_mode = #tpu.pipeline_mode<synchronous>, transform_indices = @transform_3, window_bounds = array<i64: 1, 1>}]} {
    %c0_i32 = arith.constant 0 : i32
    %0 = arith.cmpi eq, %arg0, %c0_i32 : i32
    %1 = arith.extui %0 : i1 to i32
    %c0_i32_0 = arith.constant 0 : i32
    %2 = arith.cmpi ne, %1, %c0_i32_0 : i32
    scf.if %2 {
      %cst_16 = arith.constant 0.000000e+00 : f32
      %33 = vector.broadcast %cst_16 : f32 to vector<1x1xf32>
      %c0_17 = arith.constant 0 : index
      %c0_18 = arith.constant 0 : index
      %34 = vector.load %arg4[%c0_17, %c0_18] : memref<1x1xf32, #tpu.memory_space<vmem>>, vector<1x1xf32>
      tpu.vector_store %arg4[%c0_17, %c0_18], %33 {strides = array<i32>} : memref<1x1xf32, #tpu.memory_space<vmem>>, vector<1x1xf32>,
    } else {
    }
    %c0 = arith.constant 0 : index
    %c0_1 = arith.constant 0 : index
    %3 = vector.load %arg1[%c0, %c0_1] : memref<8x128xf32, #tpu.memory_space<vmem>>, vector<8x128xf32>
    %c0_2 = arith.constant 0 : index
    %c0_3 = arith.constant 0 : index
    %4 = vector.load %arg2[%c0_2, %c0_3] : memref<8x128xf32, #tpu.memory_space<vmem>>, vector<8x128xf32>
    %5 = arith.subf %3, %4 : vector<8x128xf32>
    %cst = arith.constant 9.99999997E-7 : f32
    %6 = vector.broadcast %cst : f32 to vector<8x128xf32>
    %7 = arith.addf %5, %6 : vector<8x128xf32>
    %8 = arith.mulf %7, %7 : vector<8x128xf32>
    %cst_4 = arith.constant dense<0.000000e+00> : vector<8xf32>
    %9 = vector.multi_reduction <add>, %8, %cst_4 [1] : vector<8x128xf32> to vector<8xf32>
    %10 = vector.shape_cast %9 : vector<8xf32> to vector<8x1xf32>
    %11 = math.sqrt %10 : vector<8x1xf32>
    %cst_5 = arith.constant 2.000000e+00 : f32
    %12 = vector.broadcast %cst_5 : f32 to vector<8x1xf32>
    %13 = arith.subf %12, %11 : vector<8x1xf32>
    %cst_6 = arith.constant 0.000000e+00 : f32
    %14 = vector.broadcast %cst_6 : f32 to vector<8x1xf32>
    %15 = arith.maximumf %13, %14 : vector<8x1xf32>
    %c0_7 = arith.constant 0 : index
    %c0_8 = arith.constant 0 : index
    %16 = vector.load %arg3[%c0_7, %c0_8] : memref<8x2xf32, #tpu.memory_space<vmem>>, vector<8x1xf32>
    %c0_9 = arith.constant 0 : index
    %c1 = arith.constant 1 : index
    %17 = vector.load %arg3[%c0_9, %c1] : memref<8x2xf32, #tpu.memory_space<vmem>>, vector<8x1xf32>
    %18 = arith.mulf %16, %10 : vector<8x1xf32>
    %19 = arith.mulf %15, %15 : vector<8x1xf32>
    %20 = arith.mulf %17, %19 : vector<8x1xf32>
    %21 = arith.addf %18, %20 : vector<8x1xf32>
    %c0_10 = arith.constant 0 : index
    %c0_11 = arith.constant 0 : index
    %22 = vector.load %arg4[%c0_10, %c0_11] : memref<1x1xf32, #tpu.memory_space<vmem>>, vector<1x1xf32>
    %23 = vector.shape_cast %21 : vector<8x1xf32> to vector<1x8x1xf32>
    %cst_12 = arith.constant dense<0.000000e+00> : vector<1xf32>
    %24 = vector.multi_reduction <add>, %23, %cst_12 [1, 2] : vector<1x8x1xf32> to vector<1xf32>
    %25 = vector.shape_cast %24 : vector<1xf32> to vector<1x1x1xf32>
    %26 = vector.extract %25[0, 0, 0] : f32 from vector<1x1x1xf32>
    %27 = vector.broadcast %26 : f32 to vector<1x1xf32>
    %28 = arith.addf %22, %27 : vector<1x1xf32>
    %c0_13 = arith.constant 0 : index
    %c0_14 = arith.constant 0 : index
    %29 = vector.load %arg4[%c0_13, %c0_14] : memref<1x1xf32, #tpu.memory_space<vmem>>, vector<1x1xf32>
    tpu.vector_store %arg4[%c0_13, %c0_14], %28 {strides = array<i32>} : memref<1x1xf32, #tpu.memory_space<vmem>>, vector<1x1xf32>,
    %c1_i32 = arith.constant 1 : i32
    %30 = arith.cmpi eq, %arg0, %c1_i32 : i32
    %31 = arith.extui %30 : i1 to i32
    %c0_i32_15 = arith.constant 0 : i32
    %32 = arith.cmpi ne, %31, %c0_i32_15 : i32
    scf.if %32 {
      %c0_16 = arith.constant 0 : index
      %c0_17 = arith.constant 0 : index
      %33 = vector.load %arg4[%c0_16, %c0_17] : memref<1x1xf32, #tpu.memory_space<vmem>>, vector<1x1xf32>
      %cst_18 = arith.constant 0.0769230798 : f32
      %34 = vector.broadcast %cst_18 : f32 to vector<1x1xf32>
      %35 = arith.mulf %33, %34 : vector<1x1xf32>
      %c0_19 = arith.constant 0 : index
      %c0_20 = arith.constant 0 : index
      %36 = vector.load %arg4[%c0_19, %c0_20] : memref<1x1xf32, #tpu.memory_space<vmem>>, vector<1x1xf32>
      tpu.vector_store %arg4[%c0_19, %c0_20], %35 {strides = array<i32>} : memref<1x1xf32, #tpu.memory_space<vmem>>, vector<1x1xf32>,
    } else {
    }
    return
  }
  func.func @transform_0(%arg0: i32) -> (i32, i32) {
    %c0_i32 = arith.constant 0 : i32
    %c0_i32_0 = arith.constant 0 : i32
    return %arg0, %c0_i32 : i32, i32
  }
  func.func @transform_1(%arg0: i32) -> (i32, i32) {
    %c0_i32 = arith.constant 0 : i32
    %c0_i32_0 = arith.constant 0 : i32
    return %arg0, %c0_i32 : i32, i32
  }
  func.func @transform_2(%arg0: i32) -> (i32, i32) {
    %c0_i32 = arith.constant 0 : i32
    %c0_i32_0 = arith.constant 0 : i32
    return %arg0, %c0_i32 : i32, i32
  }
  func.func @transform_3(%arg0: i32) -> (i32, i32) {
    %c0_i32 = arith.constant 0 : i32
    %c0_i32_0 = arith.constant 0 : i32
    %c0_i32_1 = arith.constant 0 : i32
    return %c0_i32, %c0_i32_0 : i32, i32
  }
}

</mosaic_0001>

<bundles_post_ra>
// kernel: tpu_custom_call.1
= control target key start
LH: loop header
LB: loop body
LE: loop exit
PB: predicated region body
PF: predicated region fallthrough
CT: control target
= control target key end

     0   :  { %8 = vsyncpa [#allocation3], 0  ;;  %s665_s0 = inlined_call_operand.vmem [shape: f32[16,128], index: 0, kind: input, shape index: {}]   ;;  %s666_s1 = inlined_call_operand.hbm [shape: f32[16,128], index: 1, kind: input, shape index: {}]   ;;  %s667_s2 = inlined_call_operand.vmem [shape: f32[16,2], index: 2, kind: input, shape index: {}]   ;;  %s668_s3 = inlined_call_operand.hbm [shape: f32[1,1], index: 3, kind: output, shape index: {}]  }
   0x1   :  { %10 = vsyncpa [#allocation3 + $0x1], 0 }
   0x2   :  { %11 = vsyncpa [#allocation4], 0  ;;  %s530_s12 = smov 0   ;;  %s532_s13 = smov 0  }
   0x3   :  { %s534_s14 = smov 0   ;;  %s536_s15 = smov 0  }
   0x4 LB: > { %s549_s16 = sadd.s32 4294967295, %s504_s15   ;;  %s552_s17 = sadd.s32 1, %s504_s15   ;;  %s504_s15 = sphi %s536_s15, %s676_s15   ;;  %s500_s14 = sphi %s534_s14, %s675_s14   ;;  %s496_s13 = sphi %s532_s13, %s674_s13   ;;  %s492_s12 = sphi %s530_s12, %s673_s12  }
   0x5   : > { %s47_s18 = ssub.s32 %s504_s15, %s552_s17  ;;  %s50_s19 = sadd.s32 1, %s500_s14 }
   0x6   : > { %p48_p0 = scmp.eq.s32.totalorder %s47_s18, 0  ;;  %p57_p1 = scmp.ne.s32.totalorder %s500_s14, %s496_s13 }
   0x7   : > { %p58_p2 = scmp.eq.s32.totalorder %s504_s15, 0  ;;  %p63_p3 = scmp.ne.s32.totalorder %s496_s13, %s492_s12 }
   0x8   : > { %s562_s20 = scalar_select %p48_p0, %s500_s14, %s50_s19  }
   0x9   : > { %p59_p4 = por %p58_p2, %p57_p1  ;;  %p64_p5 = scmp.eq.s32.totalorder %s549_s16, 0 }
   0xa   : > { %p370_p6 = scmp.lt.s32.totalorder %s504_s15, 2  ;;  %s141_s22 = sand.u32 1, %s500_s14  }
   0xb   : > { %p566_p7 = por %p64_p5, %p63_p3  ;;  %s346_s23 = sshll.u32 %s141_s22, 3 }
   0xc   : > { %s347_s24 = sshll.u32 %s504_s15, 7  ;;  %s145_s28 = scalar_lea.vmem [#allocation2], %s346_s23 }
   0xd   : > { %s575_s27 = scalar_lea.hbm %s666_s1, %s347_s24  ;;  %s152_s29 = sshll.u32 %s145_s28, 4  ;;  %s577_s29 = int_to_ptr.vmem [resolvable:$true] %s152_s29 }
   0xe   : > { %p579_p8 = pnand %p370_p6, %p59_p4  ;;  %s142_s4 = scalar_lea.sflag [#allocation3], %s141_s22 }
   0xf   : > { %s410_s5 = scalar_lea.hbm %s575_s27, 128  ;;  %s415_s8 = scalar_lea.hbm %s666_s1, 256 }
  0x10   : > { %p411_p11 = scmp.ne.s32.totalorder %s575_s27, %s410_s5  ;;  %p412_p12 = pneg %p579_p8 }
  0x11   : > { %p416_p1 = scmp.lt.u32.totalorder %s575_s27, %s666_s1  ;;  %p417_p2 = scmp.lt.u32.totalorder %s415_s8, %s410_s5 }
  0x12   : > { %p413_p13 = pnand %p412_p12, %p411_p11  ;;  %p419_p4 = scmp.lt.u32.totalorder %s410_s5, %s575_s27 }
  0x13   : > { %p418_p3 = por %p417_p2, %p416_p1 }
  0x14   : > { %p414_p0 = pneg %p413_p13 }
  0x15   : > { %p420_p5 = por %p419_p4, %p418_p3 }
  0x17   : > { %p421_p6 = pnand %p420_p5, %p414_p0 }
  0x19   : > { %424 = shalt.err (!%p421_p6)
}
  0x1a   : > { %s425_s11 = scalar_lea.vmem %s577_s29, 128  ;;  %s506_s12 = smov [#allocation2]  }
  0x1b   : > { %p426_p11 = scmp.ne.s32.totalorder %s577_s29, %s425_s11  ;;  %s430_s18 = sshll.u32 %s506_s12, 4  ;;  %s431_s18 = int_to_ptr.vmem [resolvable:$false] %s430_s18 }
  0x1c   : > { %s432_s19 = scalar_lea.vmem %s431_s18, 256  ;;  %p433_p10 = scmp.lt.s32.totalorder %s577_s29, %s431_s18 }
  0x1d   : > { %p428_p13 = pnand %p426_p11, %p412_p12  ;;  %p434_p1 = scmp.lt.s32.totalorder %s432_s19, %s425_s11 }
  0x1f   : > { %p429_p9 = pneg %p428_p13  ;;  %p435_p2 = por %p434_p1, %p433_p10 }
  0x21   : > { %p436_p3 = pnand %p435_p2, %p429_p9 }
  0x23   : > { %439 = shalt.err (!%p436_p3)
}
  0x24   : > { %369 = dma.hbm_to_vmem [thread:$0]  (!%p579_p8), %s575_s27, 128, %s577_s29, %s142_s4  }
  0x25   : > { %p671_p0 = scmp.lt.s32.totalorder %s504_s15, 3  ;;  %p672_p4 = scmp.ge.s32.totalorder %s504_s15, 1 }
  0x27   : > { %p165_p12 = pnand %p672_p4, %p671_p0 }
  0x28   : > { %s170_s22 = sand.u32 (!%p165_p12), 1, %s496_s13  }
  0x29   : > { %168 = sbr.rel (%p165_p12) target bundleno = 593 (0x251), region = 32  ;;  %s349_s23 = sshll.u32 (!%p165_p12), %s170_s22, 3 }
  0x2a   : > { %s171_s24 = scalar_lea.sflag (!%p165_p12), [#allocation3], %s170_s22  ;;  %s174_s25 = scalar_lea.vmem (!%p165_p12), [#allocation2], %s349_s23 }
  0x30   : > { %483 = dma.done.wait (%p566_p7), %s171_s24, 128  }
  0x31   : > { %485 = vsyncadd (%p566_p7), %s171_s24, 4294967168  ;;  %p200_p9 = scmp.lt.s32.totalorder %s549_s16, 1  ;;  %p352_p8 = scmp.ne.s32.totalorder %s549_s16, 0 }
  0x32   : > { %vm212_vm0 = vcmask (!%p352_p8), 0   ;;  %v507_v0 = vmov (!%p352_p8), 0.0  }
  0x33   : > { %s201_s26 = scalar_select %p200_p9, %s549_s16, 1 }
  0x34   : > { %211 = sbr.rel (%p352_p8) target bundleno = 59 (0x3b), region = 40  ;;  %213 = vst.msk [vmem:[#allocation5] sm:$0x1] (!%p352_p8), %vm212_vm0, %v507_v0 }
  0x35   : > { %s350_s27 = sshll.u32 %s201_s26, 3 }
  0x36   : > { %s203_s29 = scalar_lea.vmem %s665_s0, %s350_s27  ;;  %s207_s5 = scalar_lea.vmem %s667_s2, %s350_s27 }
  0x3b PF: > { %v214_v1 = vld [vmem:[%s203_s29] sm:$0xff]  ;;  %s508_s21 = smov 127   ;;  %vm240_vm3 = vcmask 7168   ;;  %v239_v28 = vld [vmem:[#allocation5] sm:$0x1]  ;;  %vm253_vm4 = vcmask 0  }
  0x3c   : > { %v215_v2 = vld [vmem:[%s174_s25] sm:$0xff]  ;;  %p353_p7 = scmp.ne.s32.totalorder %s549_s16, 1 }
  0x3d   : > { %v216_v3 = vsub.f32 %v214_v1, %v215_v2  ;;  %v230_v15 = vld [vmem:[%s207_s5] sm:$0xff] }
  0x3f   : > { %v217_v4 = vadd.f32 1e-06, %v216_v3 }
  0x41   : > { %v218_v5 = vmul.f32 %v217_v4, %v217_v4 }
  0x43   : > { %219 = vadd.xlane.f32.xlu0 %v218_v5 }
  0xd0   : > { %v220_v6 = vpop.xlane.xlu0 %219 }
  0xd1   : > { %408 = vrsqrt.f32 %v220_v6  ;;  %vm223_vm1 = vcmp.eq.f32.partialorder %v220_v6, inf  ;;  %v226_v9 = vand.u32 2147483648, %v220_v6  ;;  %vm225_vm2 = vcmp.eq.f32.partialorder %v220_v6, 0.0 }
  0xd2   : > { %v231_v17 = vmul.f32 %v230_v15, %v220_v6 }
  0xdb   : > { %v409_v7 = vpop.eup %408 }
  0xdc   : > { %v222_v8 = vmul.f32 %v409_v7, %v220_v6 }
  0xde   : > { %v224_v10 = vsel %vm223_vm1, %v220_v6, %v222_v8 }
  0xdf   : > { %v227_v11 = vsel %vm225_vm2, %v226_v9, %v224_v10 }
  0xe0   : > { %v228_v12 = vsub.f32 2.0, %v227_v11 }
  0xe2   : > { %v229_v13 = vmax.f32 %v228_v12, 0.0 }
  0xe4   : > { %v232_v14 = vmul.f32 %v229_v13, %v229_v13 }
  0xe6   : > { %v233_v16 = vmul.f32 %v232_v14, %v230_v15 }
  0xe8   : > { %235 = vrot.lane.b32.xlu0 %v233_v16, %s508_s21 }
 0x15a   : > { %v236_v18 = vpop.permute.xlu0 %235 }
 0x15b   : > { %v238_v19 = vadd.f32 %v236_v18, %v231_v17 }
 0x15d   : > { %v241_v20 = vsel %vm240_vm3, %v238_v19, 0.0 }
 0x15e   : > { %242 = vadd.xlane.f32.xlu1 %v241_v20 }
 0x1eb   : > { %v243_v21 = vpop.xlane.xlu1 %242 }
 0x1ec   : > { %v244_v22 = vrot.slane %v243_v21, 4 }
 0x1ee   : > { %v245_v23 = vadd.f32 %v244_v22, %v243_v21 }
 0x1f0   : > { %v246_v24 = vrot.slane %v245_v23, 2 }
 0x1f2   : > { %v247_v25 = vadd.f32 %v246_v24, %v245_v23 }
 0x1f4   : > { %v248_v26 = vrot.slane %v247_v25, 1 }
 0x1f6   : > { %v249_v27 = vadd.f32 %v248_v26, %v247_v25 }
 0x1f8   : > { %358 = vpush %v249_v27 }
 0x227   : > { %258 = sbr.rel (%p353_p7) target bundleno = 568 (0x238), region = 44 }
 0x229   : > { %s359_s6 = spop %358 }
 0x22a   : > { %v251_v29 = vstv %s359_s6 }
 0x22b   : > { %v252_v30 = vadd.f32 %v251_v29, %v239_v28 }
 0x22d   : > { %254 = vst.msk [vmem:[#allocation5] sm:$0x1] %vm253_vm4, %v252_v30 }
 0x234   : > { %v259_v31 = vld [vmem:[#allocation5] sm:$0x1] }
 0x235   : > { %v260_v32 = vmul.f32 0.07692308, %v259_v31 }
 0x237   : > { %261 = vst.msk [vmem:[#allocation5] sm:$0x1] %vm253_vm4, %v260_v32 }
 0x238 PF: > { %p371_p10 = scmp.eq.s32.totalorder %s549_s16, 1  ;;  %s509_s7 = smov [#allocation5]  }
 0x239   : > { %s269_s8 = sshll.u32 %s509_s7, 4  ;;  %s270_s8 = int_to_ptr.vmem [resolvable:$true] %s269_s8 }
 0x23a   : > { %s440_s9 = scalar_lea.vmem %s270_s8, 16  ;;  %s446_s10 = scalar_lea.vmem %s270_s8, 32 }
 0x23b   : > { %p441_p5 = scmp.ne.s32.totalorder %s270_s8, %s440_s9  ;;  %p447_p13 = scmp.lt.s32.totalorder %s270_s8, %s270_s8 }
 0x23c   : > { %p448_p1 = scmp.lt.s32.totalorder %s446_s10, %s440_s9 }
 0x23d   : > { %p442_p6 = pnand %p441_p5, %p371_p10 }
 0x23e   : > { %p449_p2 = por %p448_p1, %p447_p13 }
 0x23f   : > { %p443_p11 = pneg %p442_p6 }
 0x241   : > { %p450_p3 = pnand %p449_p2, %p443_p11 }
 0x243   : > { %453 = shalt.err (!%p450_p3)
}
 0x244   : > { %s454_s18 = scalar_lea.hbm %s668_s3, 16 }
 0x245   : > { %p455_p0 = scmp.ne.s32.totalorder %s668_s3, %s454_s18  ;;  %p460_p9 = scmp.lt.u32.totalorder %s454_s18, %s668_s3 }
 0x247   : > { %p456_p4 = pnand %p455_p0, %p371_p10 }
 0x249   : > { %p457_p12 = pneg %p456_p4 }
 0x24b   : > { %p462_p8 = pnand %p460_p9, %p457_p12 }
 0x24d   : > { %465 = shalt.err (!%p462_p8)
}
 0x24e   : > { %363 = dma.vmem_to_hbm [thread:$0]  (%p371_p10), %s270_s8, 16, %s668_s3, [#allocation4]  }
 0x24f   : > { %487 = dma.done.wait (%p371_p10), [#allocation4], 16  }
 0x250   : > { %489 = vsyncadd (%p371_p10), [#allocation4], 4294967280 }
 0x251 PF: > { %p14_p7 = scmp.ge.s32.totalorder %s552_s17, 4   ;;  %s673_s12 = smov %s496_s13 }
 0x252   : > { %s674_s13 = smov %s500_s14  ;;  %s675_s14 = smov %s562_s20 }
 0x253   : > { %s676_s15 = smov %s552_s17  ;;  %16 = sbr.rel (!%p14_p7) target bundleno = 4 (0x4), region = 83 }
 0x25a   :  { %282 = vsyncpa [#allocation3], 1 }
 0x25b   :  { %284 = vsyncpa [#allocation3 + $0x1], 1 }
 0x25c   :  { %285 = vsyncpa [#allocation4], 1 }
 0x25d   :  { %287 = vsyncpa [#allocation4 + $0x1], 1 }

</bundles_post_ra>
